<compile_context>
chip_gen: v6e
topology: v6e:2x2x1
jax: 0.10.0
libtpu: 0.0.40
codegen_flags: <defaults>
</compile_context>

<pallas_src>
import functools
import math

import jax
import jax.numpy as jnp
from jax.experimental import pallas as pl
from jax.experimental.pallas import tpu as pltpu


def _round_up(x, m):
    return ((x + m - 1) // m) * m


def _conv_block_kernel(x_ref, w_ref, b_ref, o_ref, *, KW, Ws):
    """One batch block (Nb images).

    x_ref : (Nb, Cin_p, L_in)        zero-padded images, rows flattened, stride Ws
    w_ref : (KH*KW, Cout, Cin_p)     conv weights, one (Cout, Cin_p) slab per tap
    b_ref : (Cout, 1)
    o_ref : (Nb, Cout, L)            L multiple of 128 -> lane-dense stores
    """
    KK, Cout, _ = w_ref.shape
    Nb = x_ref.shape[0]
    L = o_ref.shape[-1]

    for b in range(Nb):
        # Start the f32 accumulator from the broadcast bias (hoisted, once per b).
        acc = jnp.broadcast_to(b_ref[...], (Cout, L)).astype(jnp.float32)
        # KH*KW tap-accumulate matmuls on statically lane-shifted views of the
        # flattened image; no im2col scratch, MXU accumulates into acc.
        for k in range(KK):
            i, j = divmod(k, KW)
            s = i * Ws + j                       # static lane shift of this tap
            acc = acc + jnp.dot(w_ref[k], x_ref[b, :, s:s + L],
                                preferred_element_type=jnp.float32)
        # LeakyReLU(negative_slope=0.2); single lane-dense store per image.
        o_ref[b] = jnp.where(acc >= 0.0, acc, 0.2 * acc).astype(o_ref.dtype)


def conv_block(x_nchw, weight, bias, *, use_bf16=False):
    """Forward of ConvBlock: LeakyReLU(Conv2d(x, padding='same'), 0.2).

    x_nchw : (N, Cin, H, W)   float32
    weight : (Cout, Cin, KH, KW)
    bias   : (Cout,)
    returns: (N, Cout, H, W)
    """
    N, Cin, H, W = x_nchw.shape
    Cout, _, KH, KW = weight.shape

    # 'same' padding (low = (K-1)//2, extra on the high side; matches PyTorch).
    ph_lo = (KH - 1) // 2
    pw_lo = (KW - 1) // 2

    # Row stride of the flattened spatial layout: >= W + KW - 1 so horizontal
    # taps never alias the next image row.  Prefer rounding Ws so H*Ws is a
    # multiple of 128; if that over-pads too much, keep the minimal Ws and pad
    # trailing junk lanes instead -> L is ALWAYS a multiple of 128.
    ws_min = W + KW - 1
    step = 128 // math.gcd(H, 128)
    Ws = _round_up(ws_min, step)
    if Ws - ws_min > max(16, ws_min // 2):
        Ws = ws_min                                  # trailing-lane pad path
    L_img = _round_up(H * Ws, 128)                   # lane-dense output length

    Cin_p = _round_up(Cin, 8)                        # sublane-aligned channels
    s_max = (KH - 1) * Ws + (KW - 1)                 # largest tap shift
    L_in = _round_up(s_max + L_img, 128)             # input lanes per image
    Hp2 = -(-L_in // Ws)                             # >= H + KH - 1 (halo + lane pad)

    # Images per grid step: fatten each step toward ~2048 lanes of matmul, but
    # keep >=2 parallel steps when N >= 2 so both v7x TensorCores are fed.
    target_lanes = 2048
    Nb = max(1, min(N, target_lanes // L_img))
    if N >= 2:
        Nb = min(Nb, (N + 1) // 2)

    def _block_bytes(nb):                            # double-buffered blocks + acc
        return 4 * (2 * nb * Cin_p * L_in + 2 * nb * Cout * L_img
                    + 2 * KH * KW * Cout * Cin_p + nb * Cout * L_img + 2 * Cout)

    vmem_budget = 24 << 20
    while Nb > 1 and _block_bytes(Nb) > vmem_budget:
        Nb -= 1
    n_steps = -(-N // Nb)
    N_p = n_steps * Nb

    # SINGLE pad pass over x in HBM: batch->N_p, channels->Cin_p, rows->Hp2
    # (covers the KH-1 halo AND the trailing lane padding), cols->Ws starting
    # at pw_lo.  x stays NCHW; no activation transpose materialized.
    xp = jnp.pad(x_nchw, ((0, N_p - N), (0, Cin_p - Cin),
                          (ph_lo, Hp2 - H - ph_lo),
                          (pw_lo, Ws - W - pw_lo)))
    x_flat = xp.reshape(N_p, Cin_p, Hp2 * Ws)

    # Weights as (KH*KW, Cout, Cin_p): each tap is a leading-dim slab in VMEM.
    w3 = jnp.transpose(weight, (2, 3, 0, 1)).reshape(KH * KW, Cout, Cin)
    w3 = jnp.pad(w3, ((0, 0), (0, 0), (0, Cin_p - Cin)))
    b2 = bias.reshape(Cout, 1).astype(jnp.float32)

    if use_bf16:                                     # faster MXU path (v6e/v7x)
        x_flat = x_flat.astype(jnp.bfloat16)
        w3 = w3.astype(jnp.bfloat16)

    kern = functools.partial(_conv_block_kernel, KW=KW, Ws=Ws)

    flops = 2 * N * Cout * H * W * KH * KW * Cin
    bytes_accessed = 4 * (x_flat.size + w3.size + b2.size + N_p * Cout * L_img)
    vmem_limit = int(min(max(2 * _block_bytes(Nb), 16 << 20), 64 << 20))

    out_flat = pl.pallas_call(
        kern,
        out_shape=jax.ShapeDtypeStruct((N_p, Cout, L_img), jnp.float32),
        grid_spec=pltpu.PrefetchScalarGridSpec(
            num_scalar_prefetch=0,
            grid=(n_steps,),                          # Nb images per step
            in_specs=[
                pl.BlockSpec((Nb, Cin_p, L_in), lambda n: (n, 0, 0)),
                pl.BlockSpec((KH * KW, Cout, Cin_p), lambda n: (0, 0, 0)),
                pl.BlockSpec((Cout, 1), lambda n: (0, 0)),
            ],
            out_specs=pl.BlockSpec((Nb, Cout, L_img), lambda n: (n, 0, 0)),
        ),
        compiler_params=pltpu.CompilerParams(
            dimension_semantics=("parallel",),        # shards steps across v7x TCs
            vmem_limit_bytes=vmem_limit),
        cost_estimate=pl.CostEstimate(flops=flops, transcendentals=0,
                                      bytes_accessed=bytes_accessed),
    )(x_flat, w3, b2)

    # One fused strip pass: drop padded batch rows, junk lanes and junk columns.
    # (Consumers that accept the padded (H, Ws) layout can skip this slice.)
    out = out_flat[:N, :, :H * Ws].reshape(N, Cout, H, Ws)[:, :, :, :W]
    return out.astype(x_nchw.dtype)


def _init_params(key, in_channels, out_channels, kernel_size):
    """Deterministic init matching nn.Conv2d defaults (kaiming-uniform a=sqrt(5))."""
    kw, kb = jax.random.split(key)
    fan_in = in_channels * kernel_size * kernel_size
    bound = 1.0 / math.sqrt(fan_in)
    weight = jax.random.uniform(
        kw, (out_channels, in_channels, kernel_size, kernel_size),
        minval=-bound, maxval=bound, dtype=jnp.float32)
    bias = jax.random.uniform(
        kb, (out_channels,), minval=-bound, maxval=bound, dtype=jnp.float32)
    return weight, bias


def _reference(x, weight, bias):
    """Pure-JAX reference (lax conv) for correctness check."""
    y = jax.lax.conv_general_dilated(
        x, weight, window_strides=(1, 1), padding="SAME",
        dimension_numbers=("NCHW", "OIHW", "NCHW"))
    y = y + bias[None, :, None, None]
    return jnp.where(y >= 0.0, y, 0.2 * y)


if __name__ == "__main__":
    # Small shapes consistent with the module's forward.
    N, Cin, Cout, H, W, K = 2, 4, 8, 16, 16, 3

    key = jax.random.PRNGKey(0)
    kx, kp = jax.random.split(key)
    x = jax.random.normal(kx, (N, Cin, H, W), dtype=jnp.float32)
    weight, bias = _init_params(kp, Cin, Cout, K)

    conv_block_jit = jax.jit(conv_block)
    out = jax.block_until_ready(conv_block_jit(x, weight, bias))

    ref = _reference(x, weight, bias)
    assert out.shape == (N, Cout, H, W)
    assert jnp.allclose(out, ref, atol=1e-5, rtol=1e-5), "mismatch vs reference"

    print("KERNEL_OK")
</pallas_src>

<mosaic_0001>
module attributes {stable_mosaic.version = 11 : i64} {
  func.func @_conv_block_kernel(%arg0: i32, %arg1: memref<1x8x512xf32, #tpu.memory_space<vmem>>, %arg2: memref<9x8x8xf32, #tpu.memory_space<vmem>>, %arg3: memref<8x1xf32, #tpu.memory_space<vmem>>, %arg4: memref<1x8x384xf32, #tpu.memory_space<vmem>>) attributes {dimension_semantics = [#tpu.dimension_semantics<parallel>], iteration_bounds = array<i64: 2>, scalar_prefetch = 0 : i64, scratch_operands = 0 : i64, tpu.core_type = #tpu.core_type<tc>, window_params = [{transform_indices = @transform_0, window_bounds = array<i64: 1, 8, 512>}, {pipeline_mode = #tpu.pipeline_mode<synchronous>, transform_indices = @transform_1, window_bounds = array<i64: 9, 8, 8>}, {pipeline_mode = #tpu.pipeline_mode<synchronous>, transform_indices = @transform_2, window_bounds = array<i64: 8, 1>}, {transform_indices = @transform_3, window_bounds = array<i64: 1, 8, 384>}]} {
    %c0 = arith.constant 0 : index
    %c0_0 = arith.constant 0 : index
    %0 = vector.load %arg3[%c0, %c0_0] : memref<8x1xf32, #tpu.memory_space<vmem>>, vector<8x1xf32>
    %1 = vector.shape_cast %0 : vector<8x1xf32> to vector<8x1xf32>
    %2 = vector.broadcast %1 : vector<8x1xf32> to vector<8x384xf32>
    %c0_1 = arith.constant 0 : index
    %c0_2 = arith.constant 0 : index
    %c0_3 = arith.constant 0 : index
    %3 = vector.load %arg2[%c0_1, %c0_2, %c0_3] : memref<9x8x8xf32, #tpu.memory_space<vmem>>, vector<1x8x8xf32>
    %4 = vector.shape_cast %3 : vector<1x8x8xf32> to vector<8x8xf32>
    %c0_4 = arith.constant 0 : index
    %c0_5 = arith.constant 0 : index
    %c0_6 = arith.constant 0 : index
    %5 = vector.load %arg1[%c0_4, %c0_5, %c0_6] : memref<1x8x512xf32, #tpu.memory_space<vmem>>, vector<1x8x384xf32>
    %6 = vector.shape_cast %5 : vector<1x8x384xf32> to vector<8x384xf32>
    %cst = arith.constant dense<0.000000e+00> : vector<8x384xf32>
    %7 = tpu.matmul %4, %6, %cst {dimension_numbers = #tpu.dot_dimension_numbers<[1], [0], [0], [1], [0, 0, 1, 1], [], []>} : vector<8x8xf32>, vector<8x384xf32>, vector<8x384xf32> -> vector<8x384xf32>
    %8 = arith.addf %2, %7 : vector<8x384xf32>
    %c1 = arith.constant 1 : index
    %c0_7 = arith.constant 0 : index
    %c0_8 = arith.constant 0 : index
    %9 = vector.load %arg2[%c1, %c0_7, %c0_8] : memref<9x8x8xf32, #tpu.memory_space<vmem>>, vector<1x8x8xf32>
    %10 = vector.shape_cast %9 : vector<1x8x8xf32> to vector<8x8xf32>
    %c0_9 = arith.constant 0 : index
    %c0_10 = arith.constant 0 : index
    %c1_11 = arith.constant 1 : index
    %11 = vector.load %arg1[%c0_9, %c0_10, %c1_11] : memref<1x8x512xf32, #tpu.memory_space<vmem>>, vector<1x8x384xf32>
    %12 = vector.shape_cast %11 : vector<1x8x384xf32> to vector<8x384xf32>
    %cst_12 = arith.constant dense<0.000000e+00> : vector<8x384xf32>
    %13 = tpu.matmul %10, %12, %cst_12 {dimension_numbers = #tpu.dot_dimension_numbers<[1], [0], [0], [1], [0, 0, 1, 1], [], []>} : vector<8x8xf32>, vector<8x384xf32>, vector<8x384xf32> -> vector<8x384xf32>
    %14 = arith.addf %8, %13 : vector<8x384xf32>
    %c2 = arith.constant 2 : index
    %c0_13 = arith.constant 0 : index
    %c0_14 = arith.constant 0 : index
    %15 = vector.load %arg2[%c2, %c0_13, %c0_14] : memref<9x8x8xf32, #tpu.memory_space<vmem>>, vector<1x8x8xf32>
    %16 = vector.shape_cast %15 : vector<1x8x8xf32> to vector<8x8xf32>
    %c0_15 = arith.constant 0 : index
    %c0_16 = arith.constant 0 : index
    %c2_17 = arith.constant 2 : index
    %17 = vector.load %arg1[%c0_15, %c0_16, %c2_17] : memref<1x8x512xf32, #tpu.memory_space<vmem>>, vector<1x8x384xf32>
    %18 = vector.shape_cast %17 : vector<1x8x384xf32> to vector<8x384xf32>
    %cst_18 = arith.constant dense<0.000000e+00> : vector<8x384xf32>
    %19 = tpu.matmul %16, %18, %cst_18 {dimension_numbers = #tpu.dot_dimension_numbers<[1], [0], [0], [1], [0, 0, 1, 1], [], []>} : vector<8x8xf32>, vector<8x384xf32>, vector<8x384xf32> -> vector<8x384xf32>
    %20 = arith.addf %14, %19 : vector<8x384xf32>
    %c3 = arith.constant 3 : index
    %c0_19 = arith.constant 0 : index
    %c0_20 = arith.constant 0 : index
    %21 = vector.load %arg2[%c3, %c0_19, %c0_20] : memref<9x8x8xf32, #tpu.memory_space<vmem>>, vector<1x8x8xf32>
    %22 = vector.shape_cast %21 : vector<1x8x8xf32> to vector<8x8xf32>
    %c0_21 = arith.constant 0 : index
    %c0_22 = arith.constant 0 : index
    %c24 = arith.constant 24 : index
    %23 = vector.load %arg1[%c0_21, %c0_22, %c24] : memref<1x8x512xf32, #tpu.memory_space<vmem>>, vector<1x8x384xf32>
    %24 = vector.shape_cast %23 : vector<1x8x384xf32> to vector<8x384xf32>
    %cst_23 = arith.constant dense<0.000000e+00> : vector<8x384xf32>
    %25 = tpu.matmul %22, %24, %cst_23 {dimension_numbers = #tpu.dot_dimension_numbers<[1], [0], [0], [1], [0, 0, 1, 1], [], []>} : vector<8x8xf32>, vector<8x384xf32>, vector<8x384xf32> -> vector<8x384xf32>
    %26 = arith.addf %20, %25 : vector<8x384xf32>
    %c4 = arith.constant 4 : index
    %c0_24 = arith.constant 0 : index
    %c0_25 = arith.constant 0 : index
    %27 = vector.load %arg2[%c4, %c0_24, %c0_25] : memref<9x8x8xf32, #tpu.memory_space<vmem>>, vector<1x8x8xf32>
    %28 = vector.shape_cast %27 : vector<1x8x8xf32> to vector<8x8xf32>
    %c0_26 = arith.constant 0 : index
    %c0_27 = arith.constant 0 : index
    %c25 = arith.constant 25 : index
    %29 = vector.load %arg1[%c0_26, %c0_27, %c25] : memref<1x8x512xf32, #tpu.memory_space<vmem>>, vector<1x8x384xf32>
    %30 = vector.shape_cast %29 : vector<1x8x384xf32> to vector<8x384xf32>
    %cst_28 = arith.constant dense<0.000000e+00> : vector<8x384xf32>
    %31 = tpu.matmul %28, %30, %cst_28 {dimension_numbers = #tpu.dot_dimension_numbers<[1], [0], [0], [1], [0, 0, 1, 1], [], []>} : vector<8x8xf32>, vector<8x384xf32>, vector<8x384xf32> -> vector<8x384xf32>
    %32 = arith.addf %26, %31 : vector<8x384xf32>
    %c5 = arith.constant 5 : index
    %c0_29 = arith.constant 0 : index
    %c0_30 = arith.constant 0 : index
    %33 = vector.load %arg2[%c5, %c0_29, %c0_30] : memref<9x8x8xf32, #tpu.memory_space<vmem>>, vector<1x8x8xf32>
    %34 = vector.shape_cast %33 : vector<1x8x8xf32> to vector<8x8xf32>
    %c0_31 = arith.constant 0 : index
    %c0_32 = arith.constant 0 : index
    %c26 = arith.constant 26 : index
    %35 = vector.load %arg1[%c0_31, %c0_32, %c26] : memref<1x8x512xf32, #tpu.memory_space<vmem>>, vector<1x8x384xf32>
    %36 = vector.shape_cast %35 : vector<1x8x384xf32> to vector<8x384xf32>
    %cst_33 = arith.constant dense<0.000000e+00> : vector<8x384xf32>
    %37 = tpu.matmul %34, %36, %cst_33 {dimension_numbers = #tpu.dot_dimension_numbers<[1], [0], [0], [1], [0, 0, 1, 1], [], []>} : vector<8x8xf32>, vector<8x384xf32>, vector<8x384xf32> -> vector<8x384xf32>
    %38 = arith.addf %32, %37 : vector<8x384xf32>
    %c6 = arith.constant 6 : index
    %c0_34 = arith.constant 0 : index
    %c0_35 = arith.constant 0 : index
    %39 = vector.load %arg2[%c6, %c0_34, %c0_35] : memref<9x8x8xf32, #tpu.memory_space<vmem>>, vector<1x8x8xf32>
    %40 = vector.shape_cast %39 : vector<1x8x8xf32> to vector<8x8xf32>
    %c0_36 = arith.constant 0 : index
    %c0_37 = arith.constant 0 : index
    %c48 = arith.constant 48 : index
    %41 = vector.load %arg1[%c0_36, %c0_37, %c48] : memref<1x8x512xf32, #tpu.memory_space<vmem>>, vector<1x8x384xf32>
    %42 = vector.shape_cast %41 : vector<1x8x384xf32> to vector<8x384xf32>
    %cst_38 = arith.constant dense<0.000000e+00> : vector<8x384xf32>
    %43 = tpu.matmul %40, %42, %cst_38 {dimension_numbers = #tpu.dot_dimension_numbers<[1], [0], [0], [1], [0, 0, 1, 1], [], []>} : vector<8x8xf32>, vector<8x384xf32>, vector<8x384xf32> -> vector<8x384xf32>
    %44 = arith.addf %38, %43 : vector<8x384xf32>
    %c7 = arith.constant 7 : index
    %c0_39 = arith.constant 0 : index
    %c0_40 = arith.constant 0 : index
    %45 = vector.load %arg2[%c7, %c0_39, %c0_40] : memref<9x8x8xf32, #tpu.memory_space<vmem>>, vector<1x8x8xf32>
    %46 = vector.shape_cast %45 : vector<1x8x8xf32> to vector<8x8xf32>
    %c0_41 = arith.constant 0 : index
    %c0_42 = arith.constant 0 : index
    %c49 = arith.constant 49 : index
    %47 = vector.load %arg1[%c0_41, %c0_42, %c49] : memref<1x8x512xf32, #tpu.memory_space<vmem>>, vector<1x8x384xf32>
    %48 = vector.shape_cast %47 : vector<1x8x384xf32> to vector<8x384xf32>
    %cst_43 = arith.constant dense<0.000000e+00> : vector<8x384xf32>
    %49 = tpu.matmul %46, %48, %cst_43 {dimension_numbers = #tpu.dot_dimension_numbers<[1], [0], [0], [1], [0, 0, 1, 1], [], []>} : vector<8x8xf32>, vector<8x384xf32>, vector<8x384xf32> -> vector<8x384xf32>
    %50 = arith.addf %44, %49 : vector<8x384xf32>
    %c8 = arith.constant 8 : index
    %c0_44 = arith.constant 0 : index
    %c0_45 = arith.constant 0 : index
    %51 = vector.load %arg2[%c8, %c0_44, %c0_45] : memref<9x8x8xf32, #tpu.memory_space<vmem>>, vector<1x8x8xf32>
    %52 = vector.shape_cast %51 : vector<1x8x8xf32> to vector<8x8xf32>
    %c0_46 = arith.constant 0 : index
    %c0_47 = arith.constant 0 : index
    %c50 = arith.constant 50 : index
    %53 = vector.load %arg1[%c0_46, %c0_47, %c50] : memref<1x8x512xf32, #tpu.memory_space<vmem>>, vector<1x8x384xf32>
    %54 = vector.shape_cast %53 : vector<1x8x384xf32> to vector<8x384xf32>
    %cst_48 = arith.constant dense<0.000000e+00> : vector<8x384xf32>
    %55 = tpu.matmul %52, %54, %cst_48 {dimension_numbers = #tpu.dot_dimension_numbers<[1], [0], [0], [1], [0, 0, 1, 1], [], []>} : vector<8x8xf32>, vector<8x384xf32>, vector<8x384xf32> -> vector<8x384xf32>
    %56 = arith.addf %50, %55 : vector<8x384xf32>
    %cst_49 = arith.constant 0.000000e+00 : f32
    %57 = vector.broadcast %cst_49 : f32 to vector<8x384xf32>
    %58 = arith.cmpf oge, %56, %57 : vector<8x384xf32>
    %cst_50 = arith.constant 2.000000e-01 : f32
    %59 = vector.broadcast %cst_50 : f32 to vector<8x384xf32>
    %60 = arith.mulf %59, %56 : vector<8x384xf32>
    %61 = arith.select %58, %56, %60 : vector<8x384xi1>, vector<8x384xf32>
    %c0_51 = arith.constant 0 : index
    %c0_52 = arith.constant 0 : index
    %c0_53 = arith.constant 0 : index
    %62 = vector.load %arg4[%c0_51, %c0_52, %c0_53] : memref<1x8x384xf32, #tpu.memory_space<vmem>>, vector<1x8x384xf32>
    %63 = vector.shape_cast %62 : vector<1x8x384xf32> to vector<8x384xf32>
    %64 = vector.shape_cast %61 : vector<8x384xf32> to vector<1x8x384xf32>
    tpu.vector_store %arg4[%c0_51, %c0_52, %c0_53], %64 {strides = array<i32>} : memref<1x8x384xf32, #tpu.memory_space<vmem>>, vector<1x8x384xf32>,
    return
  }
  func.func @transform_0(%arg0: i32) -> (i32, i32, i32) {
    %c0_i32 = arith.constant 0 : i32
    %c0_i32_0 = arith.constant 0 : i32
    %c0_i32_1 = arith.constant 0 : i32
    return %arg0, %c0_i32, %c0_i32_0 : i32, i32, i32
  }
  func.func @transform_1(%arg0: i32) -> (i32, i32, i32) {
    %c0_i32 = arith.constant 0 : i32
    %c0_i32_0 = arith.constant 0 : i32
    %c0_i32_1 = arith.constant 0 : i32
    %c0_i32_2 = arith.constant 0 : i32
    return %c0_i32, %c0_i32_0, %c0_i32_1 : i32, i32, i32
  }
  func.func @transform_2(%arg0: i32) -> (i32, i32) {
    %c0_i32 = arith.constant 0 : i32
    %c0_i32_0 = arith.constant 0 : i32
    %c0_i32_1 = arith.constant 0 : i32
    return %c0_i32, %c0_i32_0 : i32, i32
  }
  func.func @transform_3(%arg0: i32) -> (i32, i32, i32) {
    %c0_i32 = arith.constant 0 : i32
    %c0_i32_0 = arith.constant 0 : i32
    %c0_i32_1 = arith.constant 0 : i32
    return %arg0, %c0_i32, %c0_i32_0 : i32, i32, i32
  }
}

</mosaic_0001>

<bundles_post_ra>
// kernel: conv_block.1
= control target key start
LH: loop header
LB: loop body
LE: loop exit
PB: predicated region body
PF: predicated region fallthrough
CT: control target
= control target key end

     0   :  { %s1875_s12 = smov 0   ;;  %s1980_s0 = inlined_call_operand.vmem [shape: f32[2,8,528], index: 0, kind: input, shape index: {}]   ;;  %s1981_s1 = inlined_call_operand.vmem [shape: f32[9,8,8], index: 1, kind: input, shape index: {}]   ;;  %s1982_s2 = inlined_call_operand.vmem [shape: f32[8,1], index: 2, kind: input, shape index: {}]   ;;  %s1983_s3 = inlined_call_operand.vmem [shape: f32[2,8,384], index: 3, kind: output, shape index: {}]  }
   0x1 LB: > { %s1716_s13 = sadd.s32 4294967295, %s1842_s12   ;;  %p1720_p0 = scmp.ge.s32.totalorder %s1842_s12, 1  ;;  %s1842_s12 = sphi %s1875_s12, %s13_s12  }
   0x2   : > { %p137_p1 = scmp.lt.s32.totalorder %s1842_s12, 3 }
   0x4   : > { %p138_p2 = pnand %p1720_p0, %p137_p1 }
   0x5   : > { %p161_p3 = scmp.lt.s32.totalorder (!%p138_p2), %s1716_s13, 1  ;;  %s1846_s18 = smov (!%p138_p2), 127  }
   0x6   : > { %141 = sbr.rel (%p138_p2) target bundleno = 395 (0x18b), region = 32  ;;  %s1847_s21 = smov (!%p138_p2), 126  }
   0x7   : > { %s1848_s22 = smov (!%p138_p2), 104   ;;  %s1849_s23 = smov (!%p138_p2), 103  }
   0x8   : > { %s1850_s24 = smov (!%p138_p2), 102   ;;  %s1851_s25 = smov (!%p138_p2), 80  }
   0x9   : > { %s1852_s26 = smov (!%p138_p2), 79   ;;  %s1854_s27 = smov (!%p138_p2), 78  }
   0xb   : > { %v1844_v0 = vmov 0.0   ;;  %vm1845_vm0 = vmmov 0   ;;  %s1985_s13 = smov (!%p161_p3, %s1716_s13), 1  ;;  %v177_v4 = vld [vmem:[%s1981_s1] sm:$0xff]  ;;  %vm181_vm1 = vcmask 64512   ;;  %v1853_v6 = vmov 0  }
   0xc   : > { %1769 = vmatprep.subr.mxu1 %v1844_v0  ;;  %1771 = vmatprep.mubr.msk.f32.mxu1 %vm1845_vm0, %v1844_v0  ;;  %s1814_s14 = smul.u32 40, %s1985_s13  ;;  %v171_v7 = vld [vmem:[%s1982_s2] sm:$0xff]  ;;  %vm347_vm2 = vcmask 1039360   ;;  %v1725_v14 = vld [vmem:[%s1981_s1 + $0x8] sm:$0xff]  ;;  %vm511_vm3 = vcmask 1031168   ;;  %v1728_v21 = vld [vmem:[%s1981_s1 + $0x10] sm:$0xff] }
   0xd   : > { %249 = vmatprep.mubr.f32.mxu0 %v1844_v0  ;;  %1835 = vset.pattern.permute.xlu0 %v1853_v6  ;;  %vm675_vm4 = vcmask 850944   ;;  %v1731_v29 = vld [vmem:[%s1981_s1 + $0x18] sm:$0xff]  ;;  %vm839_vm5 = vcmask 842752   ;;  %v1734_v37 = vld [vmem:[%s1981_s1 + $0x20] sm:$0xff]  ;;  %vm1003_vm6 = vcmask 834560   ;;  %v1737_v45 = vld [vmem:[%s1981_s1 + $0x28] sm:$0xff] }
   0xe   : > { %s165_s17 = scalar_lea.vmem %s1980_s0, %s1814_s14  ;;  %vm1167_vm7 = vcmask 654336   ;;  %v1740_v53 = vld [vmem:[%s1981_s1 + $0x30] sm:$0xff]  ;;  %vm1331_vm8 = vcmask 646144   ;;  %v1743_v61 = vld [vmem:[%s1981_s1 + $0x38] sm:$0xff]  ;;  %vm1495_vm9 = vcmask 637952   ;;  %v1746_v6 = vld [vmem:[%s1981_s1 + $0x40] sm:$0xff] }
   0xf   : > { %v332_v1 = vld [vmem:[%s165_s17 + $0x8] sm:$0xff]  ;;  %v331_v2 = vld [vmem:[%s165_s17] sm:$0xff]  ;;  %v333_v3 = vld [vmem:[%s165_s17 + $0x10] sm:$0xff] }
  0x10   : > { %341 = vrot.lane.b32.xlu0 %v332_v1, %s1846_s18  ;;  %339 = vrot.lane.b32.xlu1 %v331_v2, %s1846_s18  ;;  %v334_v5 = vld [vmem:[%s165_s17 + $0x18] sm:$0xff] }
  0x11   : > { %215 = vmatprep.subr.mxu0 %v332_v1  ;;  %1770 = vmatpush3.msra.mxu1 %v333_v3 }
  0x12   : > { %216 = vmatpush1.msra.mxu0 %v331_v2  ;;  %1774 = vmatprep.subr.mxu1 %v1844_v0 }
  0x13   : > { %1772 = vmatmul.mubr.msk.f32.vlgmr.msra.gmra.mxu1 %vm181_vm1, %v177_v4  ;;  %1723 = vmatmul.mubr.msk.f32.vlgmr.msra.gmra.mxu0 %vm181_vm1, %v177_v4 }
  0x14   : > { %343 = vrot.lane.b32.xlu0 %v333_v3, %s1846_s18  ;;  %345 = vrot.lane.b32.xlu1 %v334_v5, %s1846_s18 }
  0x15   : > { %421 = vmatprep.mubr.f32.mxu0 %v1844_v0  ;;  %1776 = vmatprep.mubr.msk.f32.mxu1 %vm1845_vm0, %v1844_v0 }
  0x18   : > { %505 = vrot.lane.b32.xlu0 %v332_v1, %s1847_s21  ;;  %507 = vrot.lane.b32.xlu1 %v333_v3, %s1847_s21 }
  0x1c   : > { %503 = vrot.lane.b32.xlu0 %v331_v2, %s1847_s21  ;;  %509 = vrot.lane.b32.xlu1 %v334_v5, %s1847_s21  ;;  %s1815_s21 = smul.u32 24, %s1985_s13 }
  0x20   : > { %669 = vrot.lane.b32.xlu0 %v332_v1, %s1848_s22  ;;  %671 = vrot.lane.b32.xlu1 %v333_v3, %s1848_s22 }
  0x24   : > { %667 = vrot.lane.b32.xlu0 %v331_v2, %s1848_s22  ;;  %673 = vrot.lane.b32.xlu1 %v334_v5, %s1848_s22 }
  0x28   : > { %833 = vrot.lane.b32.xlu0 %v332_v1, %s1849_s23  ;;  %835 = vrot.lane.b32.xlu1 %v333_v3, %s1849_s23 }
  0x2c   : > { %831 = vrot.lane.b32.xlu0 %v331_v2, %s1849_s23  ;;  %837 = vrot.lane.b32.xlu1 %v334_v5, %s1849_s23 }
  0x30   : > { %997 = vrot.lane.b32.xlu0 %v332_v1, %s1850_s24  ;;  %999 = vrot.lane.b32.xlu1 %v333_v3, %s1850_s24 }
  0x34   : > { %995 = vrot.lane.b32.xlu0 %v331_v2, %s1850_s24  ;;  %1001 = vrot.lane.b32.xlu1 %v334_v5, %s1850_s24  ;;  %s170_s24 = scalar_lea.vmem %s1983_s3, %s1815_s21 }
  0x38   : > { %1161 = vrot.lane.b32.xlu0 %v332_v1, %s1851_s25  ;;  %1163 = vrot.lane.b32.xlu1 %v333_v3, %s1851_s25 }
  0x3c   : > { %1159 = vrot.lane.b32.xlu0 %v331_v2, %s1851_s25  ;;  %1165 = vrot.lane.b32.xlu1 %v334_v5, %s1851_s25 }
  0x40   : > { %1325 = vrot.lane.b32.xlu0 %v332_v1, %s1852_s26  ;;  %1327 = vrot.lane.b32.xlu1 %v333_v3, %s1852_s26 }
  0x44   : > { %1323 = vrot.lane.b32.xlu0 %v331_v2, %s1852_s26  ;;  %1329 = vrot.lane.b32.xlu1 %v334_v5, %s1852_s26 }
  0x48   : > { %1489 = vrot.lane.b32.xlu0 %v332_v1, %s1854_s27  ;;  %1491 = vrot.lane.b32.xlu1 %v333_v3, %s1854_s27 }
  0x4c   : > { %1487 = vrot.lane.b32.xlu0 %v331_v2, %s1854_s27  ;;  %1493 = vrot.lane.b32.xlu1 %v334_v5, %s1854_s27 }
  0x50   : > { %174 = vperm.xlu0 %1835, %v171_v7  }
  0x82   : > { %v342_v8 = vpop.permute.xlu0 %341  ;;  %v340_v9 = vpop.permute.xlu1 %339 }
  0x83   : > { %v348_v15 = vsel %vm347_vm2, %v340_v9, %v342_v8 }
  0x86   : > { %v344_v10 = vpop.permute.xlu0 %343  ;;  %v346_v11 = vpop.permute.xlu1 %345 }
  0x87   : > { %v350_v12 = vsel %vm347_vm2, %v344_v10, %v346_v11  ;;  %v349_v13 = vsel %vm347_vm2, %v342_v8, %v344_v10 }
  0x88   : > { %387 = vmatprep.subr.mxu0 %v349_v13  ;;  %1775 = vmatpush3.msra.mxu1 %v350_v12 }
  0x89   : > { %388 = vmatpush1.msra.mxu0 %v348_v15  ;;  %1779 = vmatprep.subr.mxu1 %v1844_v0 }
  0x8a   : > { %v506_v16 = vpop.permute.xlu0 %505  ;;  %v508_v17 = vpop.permute.xlu1 %507  ;;  %1726 = vmatmul.mubr.msk.f32.vlgmr.msra.gmra.mxu0 %vm181_vm1, %v1725_v14  ;;  %1777 = vmatmul.mubr.msk.f32.vlgmr.msra.gmra.mxu1 %vm181_vm1, %v1725_v14 }
  0x8b   : > { %v513_v18 = vsel %vm511_vm3, %v506_v16, %v508_v17  ;;  %585 = vmatprep.mubr.f32.mxu0 %v1844_v0  ;;  %1781 = vmatprep.mubr.msk.f32.mxu1 %vm1845_vm0, %v1844_v0 }
  0x8c   : > { %551 = vmatprep.subr.mxu0 %v513_v18 }
  0x8e   : > { %v504_v19 = vpop.permute.xlu0 %503  ;;  %v510_v20 = vpop.permute.xlu1 %509 }
  0x8f   : > { %v512_v22 = vsel %vm511_vm3, %v504_v19, %v506_v16  ;;  %v514_v23 = vsel %vm511_vm3, %v508_v17, %v510_v20 }
  0x90   : > { %552 = vmatpush1.msra.mxu0 %v512_v22  ;;  %1780 = vmatpush3.msra.mxu1 %v514_v23 }
  0x91   : > { %1784 = vmatprep.subr.mxu1 %v1844_v0  ;;  %1729 = vmatmul.mubr.msk.f32.vlgmr.msra.gmra.mxu0 %vm181_vm1, %v1728_v21 }
  0x92   : > { %v670_v24 = vpop.permute.xlu0 %669  ;;  %v672_v25 = vpop.permute.xlu1 %671  ;;  %1782 = vmatmul.mubr.msk.f32.vlgmr.msra.gmra.mxu1 %vm181_vm1, %v1728_v21  ;;  %749 = vmatprep.mubr.f32.mxu0 %v1844_v0 }
  0x93   : > { %v677_v26 = vsel %vm675_vm4, %v670_v24, %v672_v25  ;;  %1786 = vmatprep.mubr.msk.f32.mxu1 %vm1845_vm0, %v1844_v0 }
  0x94   : > { %715 = vmatprep.subr.mxu0 %v677_v26 }
  0x96   : > { %v668_v27 = vpop.permute.xlu0 %667  ;;  %v674_v28 = vpop.permute.xlu1 %673 }
  0x97   : > { %v676_v30 = vsel %vm675_vm4, %v668_v27, %v670_v24  ;;  %v678_v31 = vsel %vm675_vm4, %v672_v25, %v674_v28 }
  0x98   : > { %716 = vmatpush1.msra.mxu0 %v676_v30  ;;  %1785 = vmatpush3.msra.mxu1 %v678_v31 }
  0x99   : > { %1789 = vmatprep.subr.mxu1 %v1844_v0  ;;  %1732 = vmatmul.mubr.msk.f32.vlgmr.msra.gmra.mxu0 %vm181_vm1, %v1731_v29 }
  0x9a   : > { %v834_v32 = vpop.permute.xlu0 %833  ;;  %v836_v33 = vpop.permute.xlu1 %835  ;;  %1787 = vmatmul.mubr.msk.f32.vlgmr.msra.gmra.mxu1 %vm181_vm1, %v1731_v29  ;;  %913 = vmatprep.mubr.f32.mxu0 %v1844_v0 }
  0x9b   : > { %v841_v34 = vsel %vm839_vm5, %v834_v32, %v836_v33  ;;  %1791 = vmatprep.mubr.msk.f32.mxu1 %vm1845_vm0, %v1844_v0 }
  0x9c   : > { %879 = vmatprep.subr.mxu0 %v841_v34 }
  0x9e   : > { %v832_v35 = vpop.permute.xlu0 %831  ;;  %v838_v36 = vpop.permute.xlu1 %837 }
  0x9f   : > { %v840_v38 = vsel %vm839_vm5, %v832_v35, %v834_v32  ;;  %v842_v39 = vsel %vm839_vm5, %v836_v33, %v838_v36 }
  0xa0   : > { %880 = vmatpush1.msra.mxu0 %v840_v38  ;;  %1790 = vmatpush3.msra.mxu1 %v842_v39 }
  0xa1   : > { %1794 = vmatprep.subr.mxu1 %v1844_v0  ;;  %1735 = vmatmul.mubr.msk.f32.vlgmr.msra.gmra.mxu0 %vm181_vm1, %v1734_v37 }
  0xa2   : > { %v998_v40 = vpop.permute.xlu0 %997  ;;  %v1000_v41 = vpop.permute.xlu1 %999  ;;  %1792 = vmatmul.mubr.msk.f32.vlgmr.msra.gmra.mxu1 %vm181_vm1, %v1734_v37  ;;  %1077 = vmatprep.mubr.f32.mxu0 %v1844_v0 }
  0xa3   : > { %v1005_v42 = vsel %vm1003_vm6, %v998_v40, %v1000_v41  ;;  %1796 = vmatprep.mubr.msk.f32.mxu1 %vm1845_vm0, %v1844_v0 }
  0xa4   : > { %1043 = vmatprep.subr.mxu0 %v1005_v42 }
  0xa6   : > { %v996_v43 = vpop.permute.xlu0 %995  ;;  %v1002_v44 = vpop.permute.xlu1 %1001 }
  0xa7   : > { %v1004_v46 = vsel %vm1003_vm6, %v996_v43, %v998_v40  ;;  %v1006_v47 = vsel %vm1003_vm6, %v1000_v41, %v1002_v44 }
  0xa8   : > { %1044 = vmatpush1.msra.mxu0 %v1004_v46  ;;  %1795 = vmatpush3.msra.mxu1 %v1006_v47 }
  0xa9   : > { %1738 = vmatmul.mubr.msk.f32.vlgmr.msra.gmra.mxu0 %vm181_vm1, %v1737_v45  ;;  %1797 = vmatmul.mubr.msk.f32.vlgmr.msra.gmra.mxu1 %vm181_vm1, %v1737_v45 }
  0xaa   : > { %v1162_v48 = vpop.permute.xlu0 %1161  ;;  %v1164_v49 = vpop.permute.xlu1 %1163  ;;  %1799 = vmatprep.subr.mxu1 %v1844_v0  ;;  %1241 = vmatprep.mubr.f32.mxu0 %v1844_v0 }
  0xab   : > { %v1169_v50 = vsel %vm1167_vm7, %v1162_v48, %v1164_v49  ;;  %1801 = vmatprep.mubr.msk.f32.mxu1 %vm1845_vm0, %v1844_v0 }
  0xac   : > { %1207 = vmatprep.subr.mxu0 %v1169_v50 }
  0xae   : > { %v1160_v51 = vpop.permute.xlu0 %1159  ;;  %v1166_v52 = vpop.permute.xlu1 %1165 }
  0xaf   : > { %v1168_v54 = vsel %vm1167_vm7, %v1160_v51, %v1162_v48  ;;  %v1170_v55 = vsel %vm1167_vm7, %v1164_v49, %v1166_v52 }
  0xb0   : > { %1208 = vmatpush1.msra.mxu0 %v1168_v54  ;;  %1800 = vmatpush3.msra.mxu1 %v1170_v55 }
  0xb1   : > { %1741 = vmatmul.mubr.msk.f32.vlgmr.msra.gmra.mxu0 %vm181_vm1, %v1740_v53  ;;  %1802 = vmatmul.mubr.msk.f32.vlgmr.msra.gmra.mxu1 %vm181_vm1, %v1740_v53 }
  0xb2   : > { %v1326_v56 = vpop.permute.xlu0 %1325  ;;  %v1328_v57 = vpop.permute.xlu1 %1327  ;;  %1804 = vmatprep.subr.mxu1 %v1844_v0  ;;  %1405 = vmatprep.mubr.f32.mxu0 %v1844_v0 }
  0xb3   : > { %v1333_v58 = vsel %vm1331_vm8, %v1326_v56, %v1328_v57  ;;  %1806 = vmatprep.mubr.msk.f32.mxu1 %vm1845_vm0, %v1844_v0 }
  0xb4   : > { %1371 = vmatprep.subr.mxu0 %v1333_v58 }
  0xb6   : > { %v1324_v59 = vpop.permute.xlu0 %1323  ;;  %v1330_v60 = vpop.permute.xlu1 %1329 }
  0xb7   : > { %v1332_v62 = vsel %vm1331_vm8, %v1324_v59, %v1326_v56  ;;  %v1334_v63 = vsel %vm1331_vm8, %v1328_v57, %v1330_v60 }
  0xb8   : > { %1372 = vmatpush1.msra.mxu0 %v1332_v62  ;;  %1805 = vmatpush3.msra.mxu1 %v1334_v63 }
  0xb9   : > { %1744 = vmatmul.mubr.msk.f32.vlgmr.msra.gmra.mxu0 %vm181_vm1, %v1743_v61  ;;  %1807 = vmatmul.mubr.msk.f32.vlgmr.msra.gmra.mxu1 %vm181_vm1, %v1743_v61 }
  0xba   : > { %v1490_v1 = vpop.permute.xlu0 %1489  ;;  %v1492_v2 = vpop.permute.xlu1 %1491  ;;  %1809 = vmatprep.subr.mxu1 %v1844_v0  ;;  %1569 = vmatprep.mubr.f32.mxu0 %v1844_v0 }
  0xbb   : > { %v1497_v3 = vsel %vm1495_vm9, %v1490_v1, %v1492_v2  ;;  %1811 = vmatprep.mubr.msk.f32.mxu1 %vm1845_vm0, %v1844_v0 }
  0xbc   : > { %1535 = vmatprep.subr.mxu0 %v1497_v3 }
  0xbe   : > { %v1488_v4 = vpop.permute.xlu0 %1487  ;;  %v1494_v5 = vpop.permute.xlu1 %1493 }
  0xbf   : > { %v1496_v7 = vsel %vm1495_vm9, %v1488_v4, %v1490_v1  ;;  %v1498_v8 = vsel %vm1495_vm9, %v1492_v2, %v1494_v5 }
  0xc0   : > { %1536 = vmatpush1.msra.mxu0 %v1496_v7  ;;  %1810 = vmatpush3.msra.mxu1 %v1498_v8 }
  0xc1   : > { %1747 = vmatmul.mubr.msk.f32.vlgmr.msra.gmra.mxu0 %vm181_vm1, %v1746_v6  ;;  %1812 = vmatmul.mubr.msk.f32.vlgmr.msra.gmra.mxu1 %vm181_vm1, %v1746_v6 }
  0xcb   : > { %v175_v26 = vpop.permute.xlu0 %174 }
  0xd3   : > { %v322_v9 = vpop.f32.mrf.mxu1  ;;  %v251_v11 = vpop.f32.mrf.mxu0 }
  0xd4   : > { %v326_v28 = vadd.f32 %v251_v11, %v175_v26  ;;  %v328_v29 = vadd.f32 %v322_v9, %v175_v26 }
  0xd5   : > { %v1773_v10 = vpop.f32.mrf.mxu1  ;;  %v253_v0 = vpop.f32.mrf.mxu0 }
  0xd6   : > { %v327_v31 = vadd.f32 %v253_v0, %v175_v26 }
 0x14a   : > { %v494_v12 = vpop.f32.mrf.mxu1  ;;  %v423_v14 = vpop.f32.mrf.mxu0 }
 0x14b   : > { %v498_v34 = vadd.f32 %v423_v14, %v326_v28  ;;  %v500_v35 = vadd.f32 %v494_v12, %v328_v29 }
 0x14c   : > { %v1778_v13 = vpop.f32.mrf.mxu1  ;;  %v425_v16 = vpop.f32.mrf.mxu0 }
 0x14d   : > { %v499_v36 = vadd.f32 %v425_v16, %v327_v31 }
 0x151   : > { %v587_v18 = vpop.f32.mrf.mxu0 }
 0x152   : > { %v658_v15 = vpop.f32.mrf.mxu1  ;;  %v662_v38 = vadd.f32 %v587_v18, %v498_v34 }
 0x153   : > { %v589_v20 = vpop.f32.mrf.mxu0  ;;  %v664_v39 = vadd.f32 %v658_v15, %v500_v35 }
 0x154   : > { %v1783_v17 = vpop.f32.mrf.mxu1  ;;  %v663_v41 = vadd.f32 %v589_v20, %v499_v36 }
 0x159   : > { %v751_v22 = vpop.f32.mrf.mxu0 }
 0x15a   : > { %v822_v19 = vpop.f32.mrf.mxu1  ;;  %v826_v44 = vadd.f32 %v751_v22, %v662_v38 }
 0x15b   : > { %v753_v24 = vpop.f32.mrf.mxu0  ;;  %v828_v45 = vadd.f32 %v822_v19, %v664_v39 }
 0x15c   : > { %v1788_v21 = vpop.f32.mrf.mxu1  ;;  %v827_v47 = vadd.f32 %v753_v24, %v663_v41 }
 0x161   : > { %v915_v27 = vpop.f32.mrf.mxu0 }
 0x162   : > { %v986_v23 = vpop.f32.mrf.mxu1  ;;  %v990_v48 = vadd.f32 %v915_v27, %v826_v44 }
 0x163   : > { %v917_v32 = vpop.f32.mrf.mxu0  ;;  %v992_v49 = vadd.f32 %v986_v23, %v828_v45 }
 0x164   : > { %v1793_v25 = vpop.f32.mrf.mxu1  ;;  %v991_v52 = vadd.f32 %v917_v32, %v827_v47 }
 0x169   : > { %v1150_v30 = vpop.f32.mrf.mxu1  ;;  %v1079_v37 = vpop.f32.mrf.mxu0 }
 0x16a   : > { %v1154_v55 = vadd.f32 %v1079_v37, %v990_v48  ;;  %v1156_v56 = vadd.f32 %v1150_v30, %v992_v49 }
 0x16b   : > { %v1798_v33 = vpop.f32.mrf.mxu1  ;;  %v1081_v42 = vpop.f32.mrf.mxu0 }
 0x16c   : > { %v1155_v59 = vadd.f32 %v1081_v42, %v991_v52 }
 0x171   : > { %v1314_v40 = vpop.f32.mrf.mxu1  ;;  %v1243_v46 = vpop.f32.mrf.mxu0 }
 0x172   : > { %v1318_v57 = vadd.f32 %v1243_v46, %v1154_v55  ;;  %v1320_v58 = vadd.f32 %v1314_v40, %v1156_v56 }
 0x173   : > { %v1803_v43 = vpop.f32.mrf.mxu1  ;;  %v1245_v50 = vpop.f32.mrf.mxu0 }
 0x174   : > { %v1319_v63 = vadd.f32 %v1245_v50, %v1155_v59 }
 0x179   : > { %v1478_v51 = vpop.f32.mrf.mxu1  ;;  %v1407_v53 = vpop.f32.mrf.mxu0 }
 0x17a   : > { %v1482_v61 = vadd.f32 %v1407_v53, %v1318_v57  ;;  %v1484_v62 = vadd.f32 %v1478_v51, %v1320_v58 }
 0x17b   : > { %v1808_v54 = vpop.f32.mrf.mxu1  ;;  %v1409_v60 = vpop.f32.mrf.mxu0 }
 0x17c   : > { %v1483_v5 = vadd.f32 %v1409_v60, %v1319_v63 }
 0x181   : > { %v1571_v1 = vpop.f32.mrf.mxu0  ;;  %v1642_v2 = vpop.f32.mrf.mxu1 }
 0x182   : > { %v1646_v3 = vadd.f32 %v1571_v1, %v1482_v61  ;;  %v1648_v4 = vadd.f32 %v1642_v2, %v1484_v62 }
 0x183   : > { %v1573_v6 = vpop.f32.mrf.mxu0  ;;  %v1813_v7 = vpop.f32.mrf.mxu1 }
 0x184   : > { %vm1649_vm10 = vcmp.ge.f32.partialorder %v1646_v3, 0.0  ;;  %v1652_v8 = vmul.f32 0.2, %v1646_v3  ;;  %vm1651_vm11 = vcmp.ge.f32.partialorder %v1648_v4, 0.0  ;;  %v1654_v9 = vmul.f32 0.2, %v1648_v4 }
 0x185   : > { %v1647_v10 = vadd.f32 %v1573_v6, %v1483_v5 }
 0x186   : > { %v1655_v11 = vsel %vm1649_vm10, %v1646_v3, %v1652_v8  ;;  %v1657_v12 = vsel %vm1651_vm11, %v1648_v4, %v1654_v9 }
 0x187   : > { %1658 = vst [vmem:[%s170_s24] sm:$0xff] %v1655_v11  ;;  %1660 = vst [vmem:[%s170_s24 + $0x10] sm:$0xff] %v1657_v12  ;;  %vm1650_vm12 = vcmp.ge.f32.partialorder %v1647_v10, 0.0  ;;  %v1653_v0 = vmul.f32 0.2, %v1647_v10 }
 0x189   : > { %v1656_v13 = vsel %vm1650_vm12, %v1647_v10, %v1653_v0 }
 0x18a   : > { %1659 = vst [vmem:[%s170_s24 + $0x8] sm:$0xff] %v1656_v13 }
 0x18b PF: > { %s13_s12 = sadd.s32 1, %s1842_s12  }
 0x18c   : > { %p10_p4 = scmp.ge.s32.totalorder %s13_s12, 4  }
 0x18e   :  { %12 = sbr.rel (!%p10_p4) target bundleno = 1 (0x1), region = 70 }

</bundles_post_ra>
